<compile_context>
chip_gen: v7x
topology: tpu7x:2x2x1
jax: 0.10.0
libtpu: 0.0.40
codegen_flags: <defaults>
</compile_context>

<pallas_src>
import jax
import jax.numpy as jnp
from jax import lax
from jax.experimental import pallas as pl
from jax.experimental.pallas import tpu as pltpu


def _round_up(n, m):
    return ((n + m - 1) // m) * m


def _vmem_budget_bytes():
    """Generation-aware VMEM budget with ~25% headroom for Mosaic internals."""
    try:
        cap = int(getattr(pltpu.get_tpu_info(), "vmem_capacity_bytes"))
    except Exception:
        cap = 64 << 20  # conservative (v7x-sized) fallback
    return max(16 << 20, min(cap * 3 // 4, 100 << 20))


# ---------------- Fused kernel: one pass over x per batch --------------------
def _fused_kernel(x_ref, w_ref, o_ref):
    x = x_ref[0]                                     # (Cp, Lp) native dtype
    # xxT = x @ x^T: contract the lane (last) dim of both operands, f32 MXU
    # accumulation, no materialized transpose; paid once per batch.
    xxt = lax.dot_general(
        x, x, dimension_numbers=(((1,), (1,)), ((), ())),
        preferred_element_type=jnp.float32)
    # M = xxT @ (gamma*W): tiny (Cp,Cp) matmul in f32, then cast to x's dtype so
    # the big M@x matmul runs on the bf16 MXU fast path when x is bf16.
    m = jnp.dot(xxt, w_ref[...], preferred_element_type=jnp.float32).astype(x.dtype)
    o = jnp.dot(m, x, preferred_element_type=jnp.float32)
    # Residual add in the output dtype (no extra f32 round-trip of x).
    o_ref[0] = o.astype(o_ref.dtype) + x.astype(o_ref.dtype)


# -------- Two-pass fallback, pass 1: xxT over L tiles, then M ----------------
def _xxt_m_kernel(x_ref, w_ref, m_ref, acc_ref):
    l = pl.program_id(1)

    @pl.when(l == 0)
    def _():
        acc_ref[...] = jnp.zeros_like(acc_ref)

    x = x_ref[0]                                     # (Cp, TL) native dtype
    acc_ref[...] += lax.dot_general(
        x, x, dimension_numbers=(((1,), (1,)), ((), ())),
        preferred_element_type=jnp.float32)

    @pl.when(l == pl.num_programs(1) - 1)
    def _():
        # M emitted in x's dtype: pass 2 needs no per-tile cast and DMAs fewer
        # bytes when x is bf16.
        m_ref[0] = jnp.dot(acc_ref[...], w_ref[...],
                           preferred_element_type=jnp.float32).astype(m_ref.dtype)


# -------- Two-pass fallback, pass 2: o = M @ x + x per L tile ----------------
def _apply_kernel(m_ref, x_ref, o_ref):
    x = x_ref[0]                                     # (Cp, TL)
    o = jnp.dot(m_ref[0], x, preferred_element_type=jnp.float32)
    o_ref[0] = o.astype(o_ref.dtype) + x.astype(o_ref.dtype)


# ------------------------------ wrapper --------------------------------------
def simple_self_attention(x, weight, gamma, *, sym=False, compute_dtype=None,
                          tl_cap=2048, force_two_pass=False):
    """x: (B, C, *spatial); weight: (C, C, ks=1) conv1d weight (already
    spectrally normalized); gamma: (1,). Returns tensor with x's shape."""
    size = x.shape
    B, C = size[0], size[1]
    L = 1
    for s in size[2:]:
        L *= s
    out_dtype = x.dtype

    xf = x.reshape(B, C, L)
    if compute_dtype is not None:
        xf = xf.astype(compute_dtype)                # optional bf16 fast path

    w = jnp.asarray(weight, jnp.float32).reshape(C, C)
    if sym:
        w = (w + w.T) / 2.0
    # Fold gamma into the tiny conv weight: gamma*(xxT@W)@x == (xxT@(gamma*W))@x.
    w = jnp.asarray(gamma, jnp.float32).reshape(()) * w

    itemsize = jnp.dtype(xf.dtype).itemsize
    out_itemsize = jnp.dtype(out_dtype).itemsize
    sub = max(8, 32 // itemsize)          # sublane multiple: 8 f32 / 16 bf16 / 32 int8
    Cp = _round_up(C, sub)
    Lp = _round_up(L, 128)                # lane multiple only (<=127 lanes of pad)

    need_pad = (Cp != C) or (Lp != L)
    xp = jnp.pad(xf, ((0, 0), (0, Cp - C), (0, Lp - L))) if need_pad else xf
    wp = jnp.pad(w, ((0, Cp - C), (0, Cp - C))) if Cp != C else w

    budget = _vmem_budget_bytes()

    # Fused path if the per-batch slab + pipeline buffers + f32 temps fit VMEM.
    fused_live = (2 * Cp * Lp * itemsize            # double-buffered x input
                  + 2 * Cp * Lp * out_itemsize      # double-buffered output
                  + 2 * Cp * Lp * 4                 # f32 intermediates (o, residual)
                  + 6 * Cp * Cp * 4)                # xxT, M, W + slack
    if (not force_two_pass) and fused_live <= budget:
        out = pl.pallas_call(
            _fused_kernel,
            out_shape=jax.ShapeDtypeStruct((B, Cp, Lp), out_dtype),
            grid=(B,),
            in_specs=[
                pl.BlockSpec((1, Cp, Lp), lambda b: (b, 0, 0)),   # x slab
                pl.BlockSpec((Cp, Cp), lambda b: (0, 0)),         # gamma*W (f32)
            ],
            out_specs=pl.BlockSpec((1, Cp, Lp), lambda b: (b, 0, 0)),
            compiler_params=pltpu.CompilerParams(
                dimension_semantics=("parallel",),
                vmem_limit_bytes=budget),
        )(xp, wp)
    else:
        # Two-pass fallback for slabs too large for VMEM residency.
        # TL is the largest multiple-of-128 divisor of Lp that fits the budget
        # (no tile-driven over-padding of L).
        def _live(tl):
            p1 = 2 * Cp * tl * itemsize + 3 * Cp * Cp * 4
            p2 = (2 * Cp * tl * itemsize + 2 * Cp * tl * out_itemsize
                  + 2 * Cp * tl * 4 + 2 * Cp * Cp * 4)
            return max(p1, p2)

        TL = 128
        for t in range(min(_round_up(tl_cap, 128), Lp), 127, -128):
            if Lp % t == 0 and _live(t) <= budget:
                TL = t
                break
        n_l = Lp // TL

        # Pass 1: per-batch xxT accumulated over lane-dense L tiles; M at last step.
        m = pl.pallas_call(
            _xxt_m_kernel,
            out_shape=jax.ShapeDtypeStruct((B, Cp, Cp), xp.dtype),
            grid=(B, n_l),
            in_specs=[
                pl.BlockSpec((1, Cp, TL), lambda b, l: (b, 0, l)),   # x tile
                pl.BlockSpec((Cp, Cp), lambda b, l: (0, 0)),         # gamma*W (f32)
            ],
            out_specs=pl.BlockSpec((1, Cp, Cp), lambda b, l: (b, 0, 0)),
            scratch_shapes=[pltpu.VMEM((Cp, Cp), jnp.float32)],
            compiler_params=pltpu.CompilerParams(
                dimension_semantics=("parallel", "arbitrary"),
                vmem_limit_bytes=budget),
        )(xp, wp)

        # Pass 2: o = M @ x + x, fully parallel, lane-dense (multiple-of-128) stores.
        out = pl.pallas_call(
            _apply_kernel,
            out_shape=jax.ShapeDtypeStruct((B, Cp, Lp), out_dtype),
            grid=(B, n_l),
            in_specs=[
                pl.BlockSpec((1, Cp, Cp), lambda b, l: (b, 0, 0)),   # M
                pl.BlockSpec((1, Cp, TL), lambda b, l: (b, 0, l)),   # x tile
            ],
            out_specs=pl.BlockSpec((1, Cp, TL), lambda b, l: (b, 0, l)),
            compiler_params=pltpu.CompilerParams(
                dimension_semantics=("parallel", "parallel"),
                vmem_limit_bytes=budget),
        )(m, xp)

    if need_pad:
        out = out[:, :C, :L]
    return out.reshape(size)


# -------------------- parameter init (deterministic) ------------------------
def make_params(key, n_in, ks=1):
    # nn.Conv1d(n_in, n_in, ks, bias=False) weight shape: (n_in, n_in, ks)
    # kaiming_normal_: std = sqrt(2 / fan_in), fan_in = n_in * ks
    fan_in = n_in * ks
    std = (2.0 / fan_in) ** 0.5
    w = jax.random.normal(key, (n_in, n_in, ks), jnp.float32) * std

    # spectral_norm: divide by largest singular value of weight.view(n_in, -1)
    # (deterministic power iteration; parameter-setup glue, not forward compute)
    wm = w.reshape(n_in, -1)
    v = jnp.ones((wm.shape[1],), jnp.float32) / (wm.shape[1] ** 0.5)
    for _ in range(50):
        u = wm @ v
        u = u / (jnp.linalg.norm(u) + 1e-12)
        v = wm.T @ u
        v = v / (jnp.linalg.norm(v) + 1e-12)
    sigma = u @ (wm @ v)
    w_sn = w / sigma

    gamma = jnp.zeros((1,), jnp.float32)  # nn.Parameter(torch.tensor([0.0]))
    return w_sn, gamma


# ------------------------- pure-JAX reference --------------------------------
def reference(x, weight, gamma, *, sym=False):
    size = x.shape
    B, C = size[0], size[1]
    xf = x.reshape(B, C, -1).astype(jnp.float32)
    w = jnp.asarray(weight, jnp.float32).reshape(C, C)
    if sym:
        w = (w + w.T) / 2.0
    convx = jnp.einsum("oc,bcl->bol", w, xf)
    xxT = jnp.einsum("bcl,bdl->bcd", xf, xf)
    o = jnp.einsum("bcd,bdl->bcl", xxT, convx)
    o = jnp.asarray(gamma, jnp.float32).reshape(()) * o + xf
    return o.reshape(size)


# --------------------------------- main --------------------------------------
if __name__ == "__main__":
    key = jax.random.PRNGKey(0)
    kx, kw = jax.random.split(key)

    B, C, H, W = 2, 4, 16, 16          # n_in = 4, spatial flattened to L = 256
    x = jax.random.normal(kx, (B, C, H, W), jnp.float32)
    w_sn, gamma0 = make_params(kw, C, ks=1)
    gamma1 = jnp.ones((1,), jnp.float32)

    # gamma as initialized by the module (0.0) -> pure residual path (exact)
    out0 = jax.block_until_ready(simple_self_attention(x, w_sn, gamma0))
    ref0 = reference(x, w_sn, gamma0)
    assert out0.shape == x.shape
    assert jnp.allclose(out0, ref0, rtol=1e-4, atol=1e-3)

    # non-trivial gamma, fused single-pass path (C=4 padded to 8 sublanes)
    out1 = jax.block_until_ready(simple_self_attention(x, w_sn, gamma1))
    ref1 = reference(x, w_sn, gamma1)
    assert out1.shape == x.shape
    assert jnp.allclose(out1, ref1, rtol=1e-4, atol=1e-3)

    # forced two-pass fallback path, multi-tile L reduction (TL=128, n_l=2)
    out1b = jax.block_until_ready(
        simple_self_attention(x, w_sn, gamma1, force_two_pass=True, tl_cap=128))
    assert jnp.allclose(out1b, ref1, rtol=1e-4, atol=1e-3)

    # aligned shape (C%8==0, L%128==0): pad/slice-free path
    C2 = 8
    x2 = jax.random.normal(kx, (B, C2, H, W), jnp.float32)
    w2, _ = make_params(kw, C2, ks=1)
    out2 = jax.block_until_ready(simple_self_attention(x2, w2, gamma1))
    ref2 = reference(x2, w2, gamma1)
    assert jnp.allclose(out2, ref2, rtol=1e-4, atol=1e-3)

    # bf16 fast path (dtype-aware sublane padding: Cp rounds 8 -> 16)
    xb = x2.astype(jnp.bfloat16)
    outb = jax.block_until_ready(simple_self_attention(xb, w2, gamma1))
    refb = reference(xb.astype(jnp.float32), w2, gamma1)
    assert outb.dtype == jnp.bfloat16
    assert jnp.allclose(outb.astype(jnp.float32), refb, rtol=5e-2, atol=2.0)

    print("KERNEL_OK")
</pallas_src>

<mosaic_0001>
module attributes {stable_mosaic.version = 11 : i64} {
  func.func @_fused_kernel(%arg0: i32, %arg1: memref<1x8x256xf32, #tpu.memory_space<vmem>>, %arg2: memref<8x8xf32, #tpu.memory_space<vmem>>, %arg3: memref<1x8x256xf32, #tpu.memory_space<vmem>>) attributes {dimension_semantics = [#tpu.dimension_semantics<parallel>], iteration_bounds = array<i64: 2>, scalar_prefetch = 0 : i64, scratch_operands = 0 : i64, tpu.core_type = #tpu.core_type<tc>, window_params = [{transform_indices = @transform_0, window_bounds = array<i64: 1, 8, 256>}, {pipeline_mode = #tpu.pipeline_mode<synchronous>, transform_indices = @transform_1, window_bounds = array<i64: 8, 8>}, {transform_indices = @transform_2, window_bounds = array<i64: 1, 8, 256>}]} {
    %c0 = arith.constant 0 : index
    %c0_0 = arith.constant 0 : index
    %c0_1 = arith.constant 0 : index
    %0 = vector.load %arg1[%c0, %c0_0, %c0_1] : memref<1x8x256xf32, #tpu.memory_space<vmem>>, vector<1x8x256xf32>
    %1 = vector.shape_cast %0 : vector<1x8x256xf32> to vector<8x256xf32>
    %cst = arith.constant dense<0.000000e+00> : vector<8x8xf32>
    %2 = tpu.matmul %1, %1, %cst {dimension_numbers = #tpu.dot_dimension_numbers<[1], [1], [0], [0], [0, 0, 1, 0], [], []>} : vector<8x256xf32>, vector<8x256xf32>, vector<8x8xf32> -> vector<8x8xf32>
    %c0_2 = arith.constant 0 : index
    %c0_3 = arith.constant 0 : index
    %3 = vector.load %arg2[%c0_2, %c0_3] : memref<8x8xf32, #tpu.memory_space<vmem>>, vector<8x8xf32>
    %cst_4 = arith.constant dense<0.000000e+00> : vector<8x8xf32>
    %4 = tpu.matmul %2, %3, %cst_4 {dimension_numbers = #tpu.dot_dimension_numbers<[1], [0], [0], [1], [0, 0, 1, 1], [], []>} : vector<8x8xf32>, vector<8x8xf32>, vector<8x8xf32> -> vector<8x8xf32>
    %cst_5 = arith.constant dense<0.000000e+00> : vector<8x256xf32>
    %5 = tpu.matmul %4, %1, %cst_5 {dimension_numbers = #tpu.dot_dimension_numbers<[1], [0], [0], [1], [0, 0, 1, 1], [], []>} : vector<8x8xf32>, vector<8x256xf32>, vector<8x256xf32> -> vector<8x256xf32>
    %6 = arith.addf %5, %1 : vector<8x256xf32>
    %c0_6 = arith.constant 0 : index
    %c0_7 = arith.constant 0 : index
    %c0_8 = arith.constant 0 : index
    %7 = vector.load %arg3[%c0_6, %c0_7, %c0_8] : memref<1x8x256xf32, #tpu.memory_space<vmem>>, vector<1x8x256xf32>
    %8 = vector.shape_cast %7 : vector<1x8x256xf32> to vector<8x256xf32>
    %9 = vector.shape_cast %6 : vector<8x256xf32> to vector<1x8x256xf32>
    tpu.vector_store %arg3[%c0_6, %c0_7, %c0_8], %9 {strides = array<i32>} : memref<1x8x256xf32, #tpu.memory_space<vmem>>, vector<1x8x256xf32>,
    return
  }
  func.func @transform_0(%arg0: i32) -> (i32, i32, i32) {
    %c0_i32 = arith.constant 0 : i32
    %c0_i32_0 = arith.constant 0 : i32
    %c0_i32_1 = arith.constant 0 : i32
    return %arg0, %c0_i32, %c0_i32_0 : i32, i32, i32
  }
  func.func @transform_1(%arg0: i32) -> (i32, i32) {
    %c0_i32 = arith.constant 0 : i32
    %c0_i32_0 = arith.constant 0 : i32
    %c0_i32_1 = arith.constant 0 : i32
    return %c0_i32, %c0_i32_0 : i32, i32
  }
  func.func @transform_2(%arg0: i32) -> (i32, i32, i32) {
    %c0_i32 = arith.constant 0 : i32
    %c0_i32_0 = arith.constant 0 : i32
    %c0_i32_1 = arith.constant 0 : i32
    return %arg0, %c0_i32, %c0_i32_0 : i32, i32, i32
  }
}

</mosaic_0001>

<bundles_post_ra>
// kernel: tpu_custom_call.1
= control target key start
LH: loop header
LB: loop body
LE: loop exit
PB: predicated region body
PF: predicated region fallthrough
CT: control target
= control target key end

     0   :  { %7 = vsyncpa [#allocation3], 0  ;;  %s932_s0 = inlined_call_operand.hbm [shape: f32[2,8,256], index: 0, kind: input, shape index: {}]   ;;  %s933_s1 = inlined_call_operand.hbm [shape: f32[8,8], index: 1, kind: input, shape index: {}]   ;;  %s934_s2 = inlined_call_operand.hbm [shape: f32[2,8,256], index: 2, kind: output, shape index: {}]  }
   0x1   :  { %9 = vsyncpa [#allocation3 + $0x1], 0 }
   0x2   :  { %10 = vsyncpa [#allocation6], 0 }
   0x3   :  { %11 = vsyncpa [#allocation4], 0 }
   0x4   :  { %13 = vsyncpa [#allocation4 + $0x1], 0  ;;  %s727_s9 = smov 0   ;;  %s729_s10 = smov 0  }
   0x5   :  { %s731_s11 = smov 0   ;;  %s733_s12 = smov 0  }
   0x6 LB: > { %s748_s13 = sadd.s32 4294967295, %s705_s12   ;;  %s491_s14 = sadd.s32 4294967294, %s705_s12   ;;  %s705_s12 = sphi %s733_s12, %s958_s12   ;;  %s701_s11 = sphi %s731_s11, %s957_s11   ;;  %s697_s10 = sphi %s729_s10, %s956_s10   ;;  %s693_s9 = sphi %s727_s9, %s955_s9  }
   0x7   : > { %p39_p0 = scmp.ne.s32.totalorder %s697_s10, %s693_s9  ;;  %p935_p1 = scmp.eq.s32.totalorder %s748_s13, 0 }
   0x8   : > { %p90_p3 = scmp.eq.s32.totalorder %s491_s14, 1  ;;  %p492_p5 = scmp.ge.s32.totalorder %s705_s12, 1 }
   0x9   : > { %p757_p4 = por %p935_p1, %p39_p0  ;;  %p97_p7 = scmp.lt.s32.totalorder %s705_s12, 3 }
   0xa   : > { %p762_p6 = por %p90_p3, %p39_p0  ;;  %s707_s18 = smov [#allocation5]  }
   0xb   : > { %s938_s15 = scalar_select %p757_p4, 1, 0 }
   0xc   : > { %s939_s16 = scalar_select %p762_p6, 1, 0 }
   0xd   : > { %p767_p8 = pnand %p492_p5, %p97_p7  ;;  %s110_s19 = sshll.u32 %s707_s18, 4  ;;  %s111_s19 = int_to_ptr.vmem [resolvable:$true] %s110_s19 }
   0xe   : > { %s775_s20 = sadd.s32 1, %s705_s12   ;;  %s26_s24 = sadd.s32 1, %s701_s11 }
   0xf   : > { %s940_s17 = scalar_select %p767_p8, 1, 0 }
  0x10   : > { %p526_p10 = pneg %p767_p8  ;;  %s23_s22 = ssub.s32 %s705_s12, %s775_s20 }
  0x11   : > { %p785_p12 = scmp.eq.s32.totalorder %s23_s22, 0  ;;  %s577_s27 = scalar_lea.hbm %s933_s1, 128 }
  0x12   : > { %p779_p11 = pnand %p526_p10, %p935_p1  ;;  %p578_p0 = scmp.ne.s32.totalorder %s933_s1, %s577_s27 }
  0x13   : > { %s942_s23 = scalar_select %p785_p12, 1, 0 }
  0x14   : > { %p579_p3 = pneg %p779_p11  ;;  %p584_p10 = scmp.lt.u32.totalorder %s577_s27, %s933_s1 }
  0x16   : > { %p580_p5 = pnand %p579_p3, %p578_p0 }
  0x18   : > { %p581_p7 = pneg %p580_p5 }
  0x1a   : > { %p586_p9 = pnand %p584_p10, %p581_p7 }
  0x1c   : > { %589 = shalt.err (!%p586_p9)
}
  0x1d   : > { %s590_s4 = scalar_lea.vmem %s111_s19, 128  ;;  %p598_p6 = scmp.lt.s32.totalorder %s111_s19, %s111_s19 }
  0x1e   : > { %p591_p1 = scmp.ne.s32.totalorder %s111_s19, %s590_s4  ;;  %p599_p4 = scmp.lt.s32.totalorder %s590_s4, %s590_s4 }
  0x20   : > { %p593_p2 = pnand %p591_p1, %p579_p3  ;;  %p600_p8 = por %p599_p4, %p598_p6 }
  0x22   : > { %p594_p13 = pneg %p593_p2 }
  0x24   : > { %p601_p12 = pnand %p600_p8, %p594_p13 }
  0x26   : > { %604 = shalt.err (!%p601_p12)
}
  0x27   : > { %529 = dma.hbm_to_vmem [thread:$0]  (!%p779_p11), %s933_s1, 128, %s111_s19, [#allocation6]  }
  0x28   : > { %p943_p1 = scmp.ne.s32.totalorder %s942_s23, 0  ;;  %p34_p2 = scmp.eq.s32.totalorder %s705_s12, 0 }
  0x29   : > { %p944_p4 = scmp.ne.s32.totalorder %s701_s11, %s697_s10  ;;  %p945_p6 = scmp.eq.s32.totalorder %s748_s13, 1 }
  0x2a   : > { %s811_s7 = scalar_select %p943_p1, %s701_s11, %s26_s24  }
  0x2b   : > { %p819_p8 = por %p945_p6, %p944_p4  ;;  %p539_p9 = scmp.lt.s32.totalorder %s705_s12, 2 }
  0x2c   : > { %s121_s14 = sand.u32 1, %s701_s11   ;;  %p947_p12 = pmov %p944_p4 }
  0x2d   : > { %s495_s18 = sshll.u32 %s121_s14, 4  ;;  %s509_s21 = sshll.u32 %s705_s12, 8 }
  0x2e   : > { %p35_p13 = por %p34_p2, %p947_p12  ;;  %s832_s19 = scalar_lea.hbm %s932_s0, %s509_s21 }
  0x2f   : > { %s125_s23 = scalar_lea.vmem [#allocation2], %s495_s18  ;;  %s122_s27 = scalar_lea.sflag [#allocation3], %s121_s14 }
  0x30   : > { %s133_s24 = sshll.u32 %s125_s23, 4  ;;  %p834_p11 = pnand %p539_p9, %p35_p13  ;;  %s838_s24 = int_to_ptr.vmem [resolvable:$true] %s133_s24 }
  0x31   : > { %s605_s28 = scalar_lea.hbm %s832_s19, 256  ;;  %s610_s3 = scalar_lea.hbm %s932_s0, 512 }
  0x32   : > { %p606_p0 = scmp.ne.s32.totalorder %s832_s19, %s605_s28  ;;  %p607_p3 = pneg %p834_p11 }
  0x33   : > { %p611_p10 = scmp.lt.u32.totalorder %s832_s19, %s932_s0  ;;  %p612_p1 = scmp.lt.u32.totalorder %s610_s3, %s605_s28 }
  0x34   : > { %p608_p5 = pnand %p607_p3, %p606_p0  ;;  %p614_p4 = scmp.lt.u32.totalorder %s605_s28, %s832_s19 }
  0x35   : > { %p613_p2 = por %p612_p1, %p611_p10 }
  0x36   : > { %p609_p7 = pneg %p608_p5 }
  0x37   : > { %p615_p6 = por %p614_p4, %p613_p2 }
  0x39   : > { %p616_p9 = pnand %p615_p6, %p609_p7 }
  0x3b   : > { %619 = shalt.err (!%p616_p9)
}
  0x3c   : > { %s620_s6 = scalar_lea.vmem %s838_s24, 256  ;;  %s708_s14 = smov [#allocation2]  }
  0x3d   : > { %p621_p12 = scmp.ne.s32.totalorder %s838_s24, %s620_s6  ;;  %s625_s18 = sshll.u32 %s708_s14, 4  ;;  %s626_s18 = int_to_ptr.vmem [resolvable:$false] %s625_s18 }
  0x3e   : > { %s627_s21 = scalar_lea.vmem %s626_s18, 512  ;;  %p628_p5 = scmp.lt.s32.totalorder %s838_s24, %s626_s18 }
  0x3f   : > { %p623_p13 = pnand %p621_p12, %p607_p3  ;;  %p629_p10 = scmp.lt.s32.totalorder %s627_s21, %s620_s6 }
  0x41   : > { %p624_p0 = pneg %p623_p13  ;;  %p630_p1 = por %p629_p10, %p628_p5 }
  0x43   : > { %p631_p2 = pnand %p630_p1, %p624_p0 }
  0x45   : > { %634 = shalt.err (!%p631_p2)
}
  0x46   : > { %533 = dma.hbm_to_vmem [thread:$0]  (!%p834_p11), %s832_s19, 256, %s838_s24, %s122_s27  }
  0x47   : > { %p949_p7 = scmp.ne.s32.totalorder %s940_s17, 0 }
  0x48   : > { %s868_s22 = sand.u32 (!%p949_p7), 1, %s697_s10   ;;  %p950_p3 = scmp.ne.s32.totalorder (!%p949_p7), %s938_s15, 0 }
  0x49   : > { %142 = sbr.rel (%p949_p7) target bundleno = 742 (0x2e6), region = 28  ;;  %s499_s25 = sshll.u32 (!%p949_p7), %s868_s22, 4 }
  0x4a   : > { %s145_s23 = scalar_lea.sflag (!%p949_p7), [#allocation3], %s868_s22  ;;  %s148_s28 = scalar_lea.vmem (!%p949_p7), [#allocation2], %s499_s25 }
  0x50   : > { %680 = dma.done.wait (%p950_p3), %s145_s23, 256  }
  0x51   : > { %682 = vsyncadd (%p950_p3), %s145_s23, 4294967040  ;;  %p951_p11 = scmp.eq.s32.totalorder %s748_s13, 0 }
  0x53   : > { %684 = dma.done.wait (%p951_p11), [#allocation6], 128   ;;  %p952_p4 = pmov %p951_p11 }
  0x54   : > { %v709_v0 = vmov 0.0   ;;  %v174_v1 = vld [vmem:[%s148_s28 + $0x8] sm:$0xff]  ;;  %v173_v2 = vld [vmem:[%s148_s28] sm:$0xff]  ;;  %vm710_vm0 = vmmov 0   ;;  %vm246_vm1 = vcmask 64512   ;;  %s510_s15 = sshll.u32 %s748_s13, 8 }
  0x55   : > { %686 = vsyncadd (%p952_p4), [#allocation6], 4294967168  ;;  %513 = vmatprep.subr.mxu1 %v709_v0  ;;  %175 = vmatprep.subr.mxu0 %v174_v1  ;;  %v245_v3 = vld [vmem:[#allocation5] sm:$0xff]  ;;  %s172_s17 = scalar_lea.vmem [#allocation7], %s499_s25  ;;  %s888_s27 = scalar_lea.hbm %s934_s2, %s510_s15 }
  0x56   : > { %239 = vmatprep.mubr.f32.mxu0 %v174_v1  ;;  %176 = vmatpush1.xpose.msra.mxu0 %v173_v2  ;;  %s411_s19 = sshll.u32 %s172_s17, 4  ;;  %s397_s13 = scalar_lea.sflag [#allocation4], %s868_s22  ;;  %s890_s19 = int_to_ptr.vmem [resolvable:$true] %s411_s19 }
  0x57   : > { %514 = vmatpush3.msra.mxu1 %v245_v3  ;;  %515 = vmatprep.mubr.msk.f32.mxu1 %vm710_vm0, %v709_v0  ;;  %s635_s29 = scalar_lea.vmem %s890_s19, 256  ;;  %s711_s30 = smov [#allocation7]  }
  0x58   : > { %323 = vmatprep.subr.mxu1 %v174_v1  ;;  %p636_p6 = scmp.ne.s32.totalorder %s890_s19, %s635_s29  ;;  %s639_s3 = sshll.u32 %s711_s30, 4  ;;  %s640_s3 = int_to_ptr.vmem [resolvable:$false] %s639_s3 }
  0x59   : > { %240 = vmatmul.mubr.f32.vlgmr.msra.gmra.mrb[0].mxu0 %v173_v2  ;;  %s641_s4 = scalar_lea.vmem %s640_s3, 512  ;;  %p642_p13 = scmp.lt.s32.totalorder %s890_s19, %s640_s3 }
  0x5a   : > { %p637_p9 = pnand %p636_p6, %p819_p8  ;;  %p643_p0 = scmp.lt.s32.totalorder %s641_s4, %s635_s29 }
  0x5c   : > { %p638_p12 = pneg %p637_p9  ;;  %p644_p5 = por %p643_p0, %p642_p13 }
  0x5e   : > { %p645_p10 = pnand %p644_p5, %p638_p12 }
 0x12c   : > { %v241_v4 = vpop.f32.mrb[0].mxu0 }
 0x12d   : > { %v243_v5 = vpop.f32.mrb[1].mxu0  ;;  %516 = vmatmul.mubr.msk.f32.vlgmr.msra.gmra.mrb[0].mxu1 %vm246_vm1, %v241_v4 }
 0x12e   : > { %324 = vmatpush1.msra.mxu1 %v173_v2  ;;  %387 = vmatprep.mubr.f32.mxu1 %v709_v0 }
 0x200   : > { %v316_v6 = vpop.f32.mrb[0].mxu1 }
 0x201   : > { %v517_v7 = vpop.f32.mrb[1].mxu1  ;;  %503 = vmatmul.mubr.msk.f32.vlgmr.msra.gmra.mrb[2].mxu1 %vm246_vm1, %v316_v6 }
 0x2d4   : > { %v389_v8 = vpop.f32.mrb[2].mxu1 }
 0x2d5   : > { %v390_v9 = vadd.f32 %v389_v8, %v173_v2  ;;  %v391_v10 = vpop.f32.mrb[3].mxu1 }
 0x2d6   : > { %v392_v11 = vadd.f32 %v391_v10, %v174_v1 }
 0x2d7   : > { %394 = vst [vmem:[%s172_s17] sm:$0xff] %v390_v9 }
 0x2d8   : > { %395 = vst [vmem:[%s172_s17 + $0x8] sm:$0xff] %v392_v11 }
 0x2d9   : > { %648 = shalt.err (!%p645_p10)
}
 0x2da   : > { %s649_s5 = scalar_lea.hbm %s888_s27, 256  ;;  %s653_s18 = scalar_lea.hbm %s934_s2, 512 }
 0x2db   : > { %p650_p1 = scmp.ne.s32.totalorder %s888_s27, %s649_s5  ;;  %p654_p3 = scmp.lt.u32.totalorder %s888_s27, %s934_s2 }
 0x2dc   : > { %p655_p11 = scmp.lt.u32.totalorder %s653_s18, %s649_s5  ;;  %p657_p6 = scmp.lt.u32.totalorder %s649_s5, %s888_s27 }
 0x2dd   : > { %p651_p2 = pnand %p650_p1, %p819_p8 }
 0x2de   : > { %p656_p4 = por %p655_p11, %p654_p3 }
 0x2df   : > { %p652_p7 = pneg %p651_p2 }
 0x2e0   : > { %p658_p9 = por %p657_p6, %p656_p4 }
 0x2e2   : > { %p659_p12 = pnand %p658_p9, %p652_p7 }
 0x2e4   : > { %662 = shalt.err (!%p659_p12)
}
 0x2e5   : > { %524 = dma.vmem_to_hbm [thread:$0]  (%p819_p8), %s890_s19, 256, %s888_s27, %s397_s13  }
 0x2e6 PF: > { %s423_s25 = sand.u32 1, %s693_s9   ;;  %p953_p13 = scmp.ne.s32.totalorder %s939_s16, 0 }
 0x2e7   : > { %p954_p0 = scmp.ge.s32.totalorder %s705_s12, 2  ;;  %s424_s23 = scalar_lea.sflag [#allocation4], %s423_s25 }
 0x2e9   : > { %p535_p5 = pnand %p954_p0, %p953_p13 }
 0x2eb   : > { %688 = dma.done.wait (!%p535_p5), %s424_s23, 256  }
 0x2ec   : > { %690 = vsyncadd (!%p535_p5), %s424_s23, 4294967040  ;;  %p16_p10 = scmp.ge.s32.totalorder %s775_s20, 4   ;;  %s955_s9 = smov %s697_s10 }
 0x2ed   : > { %s956_s10 = smov %s701_s11  ;;  %s957_s11 = smov %s811_s7 }
 0x2ee   : > { %s958_s12 = smov %s775_s20  ;;  %18 = sbr.rel (!%p16_p10) target bundleno = 6 (0x6), region = 77 }
 0x2f5   :  { %429 = vsyncpa [#allocation3], 1 }
 0x2f6   :  { %431 = vsyncpa [#allocation3 + $0x1], 1 }
 0x2f7   :  { %432 = vsyncpa [#allocation6], 1 }
 0x2f8   :  { %433 = vsyncpa [#allocation4], 1 }
 0x2f9   :  { %435 = vsyncpa [#allocation4 + $0x1], 1 }

</bundles_post_ra>
